<compile_context>
chip_gen: v7x
topology: tpu7x:2x2x1
jax: 0.10.0
libtpu: 0.0.40
codegen_flags: <defaults>
</compile_context>

<pallas_src>
import functools

import jax
import jax.numpy as jnp
from jax.experimental import pallas as pl
from jax.experimental.pallas import tpu as pltpu

EPS = 1e-5
# Finite "minus infinity": exp() still underflows to exactly 0 for masked entries, but an
# all-zero adjacency row would give a uniform row instead of NaN (robustness; identical result
# whenever the row has a self-loop, as constructed below).
NEG_BIG = -1e30


def _full_spec(shape):
    # whole-array block: block_shape == full array dims satisfies the (8,128) divisibility rule
    return pl.BlockSpec(shape, lambda *_: (0,) * len(shape))


def _ln(y, g, b):
    m = jnp.mean(y, axis=-1, keepdims=True)
    v = jnp.mean((y - m) ** 2, axis=-1, keepdims=True)
    return (y - m) * jax.lax.rsqrt(v + EPS) * g + b


# ----------------------------- fused kernel -----------------------------------


def _block_kernel(edge_ref, x_ref, adj_ref, wqkv_ref, w1_ref, w2_ref, vec_ref,
                  o_ref, *, n_heads, n_nodes, f_out):
    N, F, nH = n_nodes, f_out, n_heads
    rows, H = x_ref.shape                                     # B*N, H (static)

    # tiny-vector slab rows (static ref slices; all arrive in ONE DMA)
    ln1_g = vec_ref[0:1, 0:H]
    ln1_b = vec_ref[1:2, 0:H]
    ln2_g = vec_ref[2:3, 0:H]
    ln2_b = vec_ref[3:4, 0:H]
    b_lin = vec_ref[4:5, 0:F]
    gsa = vec_ref[5:6, 0:F]
    bsa = vec_ref[6:7, 0:F]
    b2 = vec_ref[7:8, 0:H]
    b1 = vec_ref[8:9, 0:4 * H]

    x = x_ref[...].astype(jnp.float32)                        # (B*N, H)

    # ---- graph attention: batch 0 ONLY (PyTorch Head_Graph `break`s after i=0) ----
    x0 = _ln(x[0:N, :], ln1_g, ln1_b)                         # ln1 on batch-0 rows only
    adj = adj_ref[...].astype(jnp.float32)                    # (N, N)
    mask_bias = jnp.where(adj == 0.0, NEG_BIG, 0.0)           # hoisted out of the head loop
    # one stacked matmul produces q/k/v(folded) for ALL heads (amortizes MXU weight pushes)
    qkv = jnp.dot(x0, wqkv_ref[...], preferred_element_type=jnp.float32)   # (N, 3*nH*F)
    scale = float(F) ** -0.5

    y0 = jnp.zeros((N, F), jnp.float32)                       # projected multi-head out (batch 0)
    for h in range(nH):                                       # static unroll, no grid iterations
        q = qkv[:, h * F:(h + 1) * F]
        k = qkv[:, (nH + h) * F:(nH + h + 1) * F]
        vp = qkv[:, (2 * nH + h) * F:(2 * nH + h + 1) * F]    # value with W_lin folded in
        s = jax.lax.dot_general(q, k, (((1,), (1,)), ((), ())),
                                preferred_element_type=jnp.float32)
        s = s * scale + mask_bias
        s = s - jnp.max(s, axis=-1, keepdims=True)
        p = jnp.exp(s)
        denom = jnp.sum(p, axis=-1, keepdims=True)
        r = pl.reciprocal(denom, approx=True)                 # EUP seed ...
        r = r * (2.0 - denom * r)                             # ... + one Newton step
        # wei = e0 * softmax + e1 * adj  (edge-mix scalars from SMEM)
        wei = (edge_ref[h, 0] * r) * p + edge_ref[h, 1] * adj
        # W_lin already folded into vp -> accumulate the projected output directly
        y0 = y0 + jnp.dot(wei, vp, preferred_element_type=jnp.float32)
    y0 = y0 + b_lin

    sa0 = _ln(y0, gsa, bsa)                                   # (N, F)  batch-0 attention rows
    # batches > 0: head outputs are all-zero -> Linear gives b_lin -> LayerNorm gives ONE constant
    # row; compute it once instead of projecting (B-1)*N all-zero rows.
    sab = _ln(b_lin, gsa, bsa)                                # (1, F)

    # ---- residual 1: x1 = x + sa  (kept entirely in vregs; no scratch round-trip) ----
    if rows > N:
        sa_all = jnp.concatenate(
            [sa0, jnp.broadcast_to(sab, (rows - N, F))], axis=0)
    else:
        sa_all = sa0
    x1 = x + sa_all

    # ---- ln2 + FeedForward + residual 2 ----------------------------------------
    ln2 = _ln(x1, ln2_g, ln2_b)
    hid = jnp.dot(ln2, w1_ref[...], preferred_element_type=jnp.float32) + b1
    hid = jnp.maximum(hid, 0.0)                               # 4*H = 128 -> lane-dense hidden
    ff = jnp.dot(hid, w2_ref[...], preferred_element_type=jnp.float32) + b2
    o_ref[...] = (x1 + ff).astype(o_ref.dtype)


# ----------------------------- wrapper -----------------------------------------


def prepare_params(params):
    """One-time packing of module parameters into the fused kernel's layout."""
    nH, H, F = params["wq"].shape
    W = max(4 * H, F, H)

    def stack_heads(w):  # (nH, H, F) -> (H, nH*F); column block h == w[h]
        return jnp.transpose(w, (1, 0, 2)).reshape(H, nH * F)

    # Fold the multi-head output projection into the value weights:
    #   cat_h(wei_h @ (x Wv_h)) @ Wlin == sum_h wei_h @ (x (Wv_h @ Wlin_h))
    wv_fold = jnp.einsum("hif,hfo->hio", params["wv"],
                         params["w_lin"].reshape(nH, F, F),
                         precision=jax.lax.Precision.HIGHEST)

    def row(v):  # pad every tiny vector to the slab width
        v = v.reshape(1, -1).astype(jnp.float32)
        return jnp.pad(v, ((0, 0), (0, W - v.shape[1])))

    vecs = jnp.concatenate([
        row(params["ln1_g"]), row(params["ln1_b"]),
        row(params["ln2_g"]), row(params["ln2_b"]),
        row(params["b_lin"]), row(params["ln_sa_g"]), row(params["ln_sa_b"]),
        row(params["b2"]), row(params["b1"]),
    ], axis=0)                                                                     # (9, W)

    return {
        "edge_w": jax.nn.softmax(params["edge_w"], axis=-1).astype(jnp.float32),   # (nH, 2)
        "wqkv": jnp.concatenate([stack_heads(params["wq"]),
                                 stack_heads(params["wk"]),
                                 stack_heads(wv_fold)], axis=-1),                  # (H, 3*nH*F)
        "w1": params["w1"],                                                        # (H, 4H)
        "w2": params["w2"],                                                        # (4H, H)
        "vecs": vecs,
    }


@jax.jit
def block_neighbour_forward(x, adj, packed):
    B, N, H = x.shape
    F = H                                         # residual requires f_out_size == h_size
    assert packed["wqkv"].shape[0] == H
    nH = packed["wqkv"].shape[1] // (3 * F)
    nvec, W = packed["vecs"].shape
    x2 = x.reshape(B * N, H)

    kernel = functools.partial(_block_kernel, n_heads=nH, n_nodes=N, f_out=F)
    out = pl.pallas_call(
        kernel,
        out_shape=jax.ShapeDtypeStruct((B * N, H), x.dtype),
        in_specs=[
            pl.BlockSpec(memory_space=pltpu.MemorySpace.SMEM),   # softmaxed edge weights (nH, 2)
            _full_spec((B * N, H)),                              # x (flattened)
            _full_spec((N, N)),                                  # adjacency
            _full_spec((H, 3 * nH * F)),                         # stacked q/k/v(folded) weights
            _full_spec((H, 4 * H)),                              # FFN w1
            _full_spec((4 * H, H)),                              # FFN w2
            _full_spec((nvec, W)),                               # coalesced tiny-vector slab
        ],
        out_specs=_full_spec((B * N, H)),
    )(packed["edge_w"], x2, adj, packed["wqkv"], packed["w1"], packed["w2"],
      packed["vecs"])
    return out.reshape(B, N, H)


# ----------------------------- reference (plain JAX) ----------------------------


def reference_forward(x, adj, params, precision=jax.lax.Precision.HIGHEST):
    dot = functools.partial(jnp.dot, precision=precision)

    def ln(y, g, b):
        m = jnp.mean(y, -1, keepdims=True)
        v = jnp.mean((y - m) ** 2, -1, keepdims=True)
        return (y - m) / jnp.sqrt(v + EPS) * g + b

    B, N, H = x.shape
    nH, _, F = params["wq"].shape
    ln1x = ln(x, params["ln1_g"], params["ln1_b"])
    x0 = ln1x[0]                                   # batch 0 only (PyTorch `break`)
    outs = []
    for h in range(nH):
        q = dot(x0, params["wq"][h])
        k = dot(x0, params["wk"][h])
        v = dot(x0, params["wv"][h])
        s = dot(q, k.T) * (float(F) ** -0.5)
        s = jnp.where(adj == 0.0, -jnp.inf, s)
        p = jax.nn.softmax(s, axis=-1)
        we = jax.nn.softmax(params["edge_w"][h])
        outs.append(dot(we[0] * p + we[1] * adj, v))
    cat0 = jnp.concatenate(outs, -1)
    cat = jnp.zeros((B, N, nH * F), jnp.float32).at[0].set(cat0)
    sa = ln(dot(cat, params["w_lin"]) + params["b_lin"],
            params["ln_sa_g"], params["ln_sa_b"])
    x1 = x + sa
    ln2x = ln(x1, params["ln2_g"], params["ln2_b"])
    ff = dot(jnp.maximum(dot(ln2x, params["w1"]) + params["b1"], 0.0),
             params["w2"]) + params["b2"]
    return x1 + ff


# ----------------------------- main ----------------------------------------------


if __name__ == "__main__":
    B, N, H, F, n_heads = 2, 16, 32, 32, 2

    key = jax.random.PRNGKey(0)
    ks = jax.random.split(key, 16)

    def xavier(k, shape):
        fan_in, fan_out = shape[-2], shape[-1]
        std = (2.0 / (fan_in + fan_out)) ** 0.5
        return std * jax.random.normal(k, shape, jnp.float32)

    params = {
        # per-head q/k/v projection weights, stored (n_heads, H, F)
        "wq": xavier(ks[0], (n_heads, H, F)),
        "wk": xavier(ks[1], (n_heads, H, F)),
        "wv": xavier(ks[2], (n_heads, H, F)),
        # per-head edge-mixing logits (weighting1, weighting2)
        "edge_w": jax.random.normal(ks[3], (n_heads, 2), jnp.float32),
        # multi-head output projection + its LayerNorm
        "w_lin": xavier(ks[4], (n_heads * F, F)),
        "b_lin": 0.1 * jax.random.normal(ks[5], (F,), jnp.float32),
        "ln_sa_g": jnp.ones((F,), jnp.float32),
        "ln_sa_b": jnp.zeros((F,), jnp.float32),
        # block LayerNorms
        "ln1_g": jnp.ones((H,), jnp.float32),
        "ln1_b": jnp.zeros((H,), jnp.float32),
        "ln2_g": jnp.ones((H,), jnp.float32),
        "ln2_b": jnp.zeros((H,), jnp.float32),
        # FeedForward
        "w1": xavier(ks[6], (H, 4 * H)),
        "b1": 0.1 * jax.random.normal(ks[7], (4 * H,), jnp.float32),
        "w2": xavier(ks[8], (4 * H, H)),
        "b2": 0.1 * jax.random.normal(ks[9], (H,), jnp.float32),
    }

    # adjacency: random 0/1 with self-loops (every row has >=1 neighbour -> no NaN softmax rows)
    adj = (jax.random.uniform(ks[10], (N, N)) < 0.3).astype(jnp.float32)
    adj = jnp.maximum(adj, jnp.eye(N, dtype=jnp.float32))

    x = jax.random.normal(ks[11], (B, N, H), jnp.float32)

    packed = prepare_params(params)
    out = block_neighbour_forward(x, adj, packed)
    out = jax.block_until_ready(out)

    # The kernel's MXU f32 matmuls use Mosaic's f32 pass decomposition, whereas XLA's dot at
    # Precision.DEFAULT runs reduced-precision bf16 passes on TPU.  Compare against references at
    # both precisions and require an f32-level match with whichever one shares the kernel's
    # matmul semantics (a real bug would miss both by a wide margin).
    ref_hi = reference_forward(x, adj, params, precision=jax.lax.Precision.HIGHEST)
    ref_lo = reference_forward(x, adj, params, precision=jax.lax.Precision.DEFAULT)
    diff_hi = float(jnp.max(jnp.abs(out - ref_hi)))
    diff_lo = float(jnp.max(jnp.abs(out - ref_lo)))

    assert out.shape == (B, N, H)
    assert bool(jnp.all(jnp.isfinite(out)))
    assert min(diff_hi, diff_lo) < 1e-3, f"mismatch vs reference: {diff_hi=} {diff_lo=}"

    print("KERNEL_OK")
</pallas_src>

<mosaic_0001>
module attributes {stable_mosaic.version = 11 : i64} {
  func.func @_block_kernel(%arg0: memref<2x2xf32, #tpu.memory_space<smem>>, %arg1: memref<32x32xf32, #tpu.memory_space<vmem>>, %arg2: memref<16x16xf32, #tpu.memory_space<vmem>>, %arg3: memref<32x192xf32, #tpu.memory_space<vmem>>, %arg4: memref<32x128xf32, #tpu.memory_space<vmem>>, %arg5: memref<128x32xf32, #tpu.memory_space<vmem>>, %arg6: memref<9x128xf32, #tpu.memory_space<vmem>>, %arg7: memref<32x32xf32, #tpu.memory_space<vmem>>) attributes {dimension_semantics = [], scalar_prefetch = 0 : i64, scratch_operands = 0 : i64, tpu.core_type = #tpu.core_type<tc>} {
    %c0 = arith.constant 0 : index
    %c0_0 = arith.constant 0 : index
    %0 = vector.load %arg6[%c0, %c0_0] : memref<9x128xf32, #tpu.memory_space<vmem>>, vector<1x32xf32>
    %c1 = arith.constant 1 : index
    %c0_1 = arith.constant 0 : index
    %1 = vector.load %arg6[%c1, %c0_1] : memref<9x128xf32, #tpu.memory_space<vmem>>, vector<1x32xf32>
    %c2 = arith.constant 2 : index
    %c0_2 = arith.constant 0 : index
    %2 = vector.load %arg6[%c2, %c0_2] : memref<9x128xf32, #tpu.memory_space<vmem>>, vector<1x32xf32>
    %c3 = arith.constant 3 : index
    %c0_3 = arith.constant 0 : index
    %3 = vector.load %arg6[%c3, %c0_3] : memref<9x128xf32, #tpu.memory_space<vmem>>, vector<1x32xf32>
    %c4 = arith.constant 4 : index
    %c0_4 = arith.constant 0 : index
    %4 = vector.load %arg6[%c4, %c0_4] : memref<9x128xf32, #tpu.memory_space<vmem>>, vector<1x32xf32>
    %c5 = arith.constant 5 : index
    %c0_5 = arith.constant 0 : index
    %5 = vector.load %arg6[%c5, %c0_5] : memref<9x128xf32, #tpu.memory_space<vmem>>, vector<1x32xf32>
    %c6 = arith.constant 6 : index
    %c0_6 = arith.constant 0 : index
    %6 = vector.load %arg6[%c6, %c0_6] : memref<9x128xf32, #tpu.memory_space<vmem>>, vector<1x32xf32>
    %c7 = arith.constant 7 : index
    %c0_7 = arith.constant 0 : index
    %7 = vector.load %arg6[%c7, %c0_7] : memref<9x128xf32, #tpu.memory_space<vmem>>, vector<1x32xf32>
    %c8 = arith.constant 8 : index
    %c0_8 = arith.constant 0 : index
    %8 = vector.load %arg6[%c8, %c0_8] : memref<9x128xf32, #tpu.memory_space<vmem>>, vector<1x128xf32>
    %c0_9 = arith.constant 0 : index
    %c0_10 = arith.constant 0 : index
    %9 = vector.load %arg1[%c0_9, %c0_10] : memref<32x32xf32, #tpu.memory_space<vmem>>, vector<32x32xf32>
    %10 = vector.extract_strided_slice %9 {offsets = [0, 0], sizes = [16, 32], strides = [1, 1]} : vector<32x32xf32> to vector<16x32xf32>
    %cst = arith.constant dense<0.000000e+00> : vector<16xf32>
    %11 = vector.multi_reduction <add>, %10, %cst [1] : vector<16x32xf32> to vector<16xf32>
    %12 = vector.shape_cast %11 : vector<16xf32> to vector<16x1xf32>
    %cst_11 = arith.constant 3.200000e+01 : f32
    %13 = vector.broadcast %cst_11 : f32 to vector<16x1xf32>
    %14 = arith.divf %12, %13 : vector<16x1xf32>
    %15 = vector.broadcast %14 : vector<16x1xf32> to vector<16x32xf32>
    %16 = arith.subf %10, %15 : vector<16x32xf32>
    %17 = arith.mulf %16, %16 : vector<16x32xf32>
    %cst_12 = arith.constant dense<0.000000e+00> : vector<16xf32>
    %18 = vector.multi_reduction <add>, %17, %cst_12 [1] : vector<16x32xf32> to vector<16xf32>
    %19 = vector.shape_cast %18 : vector<16xf32> to vector<16x1xf32>
    %cst_13 = arith.constant 3.200000e+01 : f32
    %20 = vector.broadcast %cst_13 : f32 to vector<16x1xf32>
    %21 = arith.divf %19, %20 : vector<16x1xf32>
    %22 = vector.broadcast %14 : vector<16x1xf32> to vector<16x32xf32>
    %23 = arith.subf %10, %22 : vector<16x32xf32>
    %cst_14 = arith.constant 9.99999974E-6 : f32
    %24 = vector.broadcast %cst_14 : f32 to vector<16x1xf32>
    %25 = arith.addf %21, %24 : vector<16x1xf32>
    %26 = math.rsqrt %25 : vector<16x1xf32>
    %27 = vector.broadcast %26 : vector<16x1xf32> to vector<16x32xf32>
    %28 = arith.mulf %23, %27 : vector<16x32xf32>
    %29 = vector.broadcast %0 : vector<1x32xf32> to vector<16x32xf32>
    %30 = arith.mulf %28, %29 : vector<16x32xf32>
    %31 = vector.broadcast %1 : vector<1x32xf32> to vector<16x32xf32>
    %32 = arith.addf %30, %31 : vector<16x32xf32>
    %c0_15 = arith.constant 0 : index
    %c0_16 = arith.constant 0 : index
    %33 = vector.load %arg2[%c0_15, %c0_16] : memref<16x16xf32, #tpu.memory_space<vmem>>, vector<16x16xf32>
    %cst_17 = arith.constant 0.000000e+00 : f32
    %34 = vector.broadcast %cst_17 : f32 to vector<16x16xf32>
    %35 = arith.cmpf oeq, %33, %34 : vector<16x16xf32>
    %cst_18 = arith.constant -1.000000e+30 : f32
    %cst_19 = arith.constant 0.000000e+00 : f32
    %36 = vector.broadcast %cst_18 : f32 to vector<16x16xf32>
    %37 = vector.broadcast %cst_19 : f32 to vector<16x16xf32>
    %38 = arith.select %35, %36, %37 : vector<16x16xi1>, vector<16x16xf32>
    %c0_20 = arith.constant 0 : index
    %c0_21 = arith.constant 0 : index
    %39 = vector.load %arg3[%c0_20, %c0_21] : memref<32x192xf32, #tpu.memory_space<vmem>>, vector<32x192xf32>
    %cst_22 = arith.constant dense<0.000000e+00> : vector<16x192xf32>
    %40 = tpu.matmul %32, %39, %cst_22 {dimension_numbers = #tpu.dot_dimension_numbers<[1], [0], [0], [1], [0, 0, 1, 1], [], []>} : vector<16x32xf32>, vector<32x192xf32>, vector<16x192xf32> -> vector<16x192xf32>
    %cst_23 = arith.constant 0.000000e+00 : f32
    %41 = vector.broadcast %cst_23 : f32 to vector<16x32xf32>
    %42 = vector.extract_strided_slice %40 {offsets = [0, 0], sizes = [16, 32], strides = [1, 1]} : vector<16x192xf32> to vector<16x32xf32>
    %43 = vector.extract_strided_slice %40 {offsets = [0, 64], sizes = [16, 32], strides = [1, 1]} : vector<16x192xf32> to vector<16x32xf32>
    %44 = vector.extract_strided_slice %40 {offsets = [0, 128], sizes = [16, 32], strides = [1, 1]} : vector<16x192xf32> to vector<16x32xf32>
    %cst_24 = arith.constant dense<0.000000e+00> : vector<16x16xf32>
    %45 = tpu.matmul %42, %43, %cst_24 {dimension_numbers = #tpu.dot_dimension_numbers<[1], [1], [0], [0], [0, 0, 1, 0], [], []>} : vector<16x32xf32>, vector<16x32xf32>, vector<16x16xf32> -> vector<16x16xf32>
    %cst_25 = arith.constant 0.176776692 : f32
    %46 = vector.broadcast %cst_25 : f32 to vector<16x16xf32>
    %47 = arith.mulf %45, %46 : vector<16x16xf32>
    %48 = arith.addf %47, %38 : vector<16x16xf32>
    %cst_26 = arith.constant dense<0xFF800000> : vector<16xf32>
    %49 = vector.multi_reduction <maximumf>, %48, %cst_26 [1] : vector<16x16xf32> to vector<16xf32>
    %50 = vector.shape_cast %49 : vector<16xf32> to vector<16x1xf32>
    %51 = vector.broadcast %50 : vector<16x1xf32> to vector<16x16xf32>
    %52 = arith.subf %48, %51 : vector<16x16xf32>
    %53 = math.exp %52 : vector<16x16xf32>
    %cst_27 = arith.constant dense<0.000000e+00> : vector<16xf32>
    %54 = vector.multi_reduction <add>, %53, %cst_27 [1] : vector<16x16xf32> to vector<16xf32>
    %55 = vector.shape_cast %54 : vector<16xf32> to vector<16x1xf32>
    %56 = tpu.reciprocal %55 {approx = true} : vector<16x1xf32> -> vector<16x1xf32>
    %57 = arith.mulf %55, %56 : vector<16x1xf32>
    %cst_28 = arith.constant 2.000000e+00 : f32
    %58 = vector.broadcast %cst_28 : f32 to vector<16x1xf32>
    %59 = arith.subf %58, %57 : vector<16x1xf32>
    %60 = arith.mulf %56, %59 : vector<16x1xf32>
    %c0_29 = arith.constant 0 : index
    %c0_30 = arith.constant 0 : index
    %61 = memref.load %arg0[%c0_29, %c0_30] : memref<2x2xf32, #tpu.memory_space<smem>>
    %62 = vector.broadcast %61 : f32 to vector<16x1xf32>
    %63 = arith.mulf %62, %60 : vector<16x1xf32>
    %64 = vector.broadcast %63 : vector<16x1xf32> to vector<16x16xf32>
    %65 = arith.mulf %64, %53 : vector<16x16xf32>
    %c0_31 = arith.constant 0 : index
    %c1_32 = arith.constant 1 : index
    %66 = memref.load %arg0[%c0_31, %c1_32] : memref<2x2xf32, #tpu.memory_space<smem>>
    %67 = vector.broadcast %66 : f32 to vector<16x16xf32>
    %68 = arith.mulf %67, %33 : vector<16x16xf32>
    %69 = arith.addf %65, %68 : vector<16x16xf32>
    %cst_33 = arith.constant dense<0.000000e+00> : vector<16x32xf32>
    %70 = tpu.matmul %69, %44, %cst_33 {dimension_numbers = #tpu.dot_dimension_numbers<[1], [0], [0], [1], [0, 0, 1, 1], [], []>} : vector<16x16xf32>, vector<16x32xf32>, vector<16x32xf32> -> vector<16x32xf32>
    %71 = arith.addf %41, %70 : vector<16x32xf32>
    %72 = vector.extract_strided_slice %40 {offsets = [0, 32], sizes = [16, 32], strides = [1, 1]} : vector<16x192xf32> to vector<16x32xf32>
    %73 = vector.extract_strided_slice %40 {offsets = [0, 96], sizes = [16, 32], strides = [1, 1]} : vector<16x192xf32> to vector<16x32xf32>
    %74 = vector.extract_strided_slice %40 {offsets = [0, 160], sizes = [16, 32], strides = [1, 1]} : vector<16x192xf32> to vector<16x32xf32>
    %cst_34 = arith.constant dense<0.000000e+00> : vector<16x16xf32>
    %75 = tpu.matmul %72, %73, %cst_34 {dimension_numbers = #tpu.dot_dimension_numbers<[1], [1], [0], [0], [0, 0, 1, 0], [], []>} : vector<16x32xf32>, vector<16x32xf32>, vector<16x16xf32> -> vector<16x16xf32>
    %cst_35 = arith.constant 0.176776692 : f32
    %76 = vector.broadcast %cst_35 : f32 to vector<16x16xf32>
    %77 = arith.mulf %75, %76 : vector<16x16xf32>
    %78 = arith.addf %77, %38 : vector<16x16xf32>
    %cst_36 = arith.constant dense<0xFF800000> : vector<16xf32>
    %79 = vector.multi_reduction <maximumf>, %78, %cst_36 [1] : vector<16x16xf32> to vector<16xf32>
    %80 = vector.shape_cast %79 : vector<16xf32> to vector<16x1xf32>
    %81 = vector.broadcast %80 : vector<16x1xf32> to vector<16x16xf32>
    %82 = arith.subf %78, %81 : vector<16x16xf32>
    %83 = math.exp %82 : vector<16x16xf32>
    %cst_37 = arith.constant dense<0.000000e+00> : vector<16xf32>
    %84 = vector.multi_reduction <add>, %83, %cst_37 [1] : vector<16x16xf32> to vector<16xf32>
    %85 = vector.shape_cast %84 : vector<16xf32> to vector<16x1xf32>
    %86 = tpu.reciprocal %85 {approx = true} : vector<16x1xf32> -> vector<16x1xf32>
    %87 = arith.mulf %85, %86 : vector<16x1xf32>
    %cst_38 = arith.constant 2.000000e+00 : f32
    %88 = vector.broadcast %cst_38 : f32 to vector<16x1xf32>
    %89 = arith.subf %88, %87 : vector<16x1xf32>
    %90 = arith.mulf %86, %89 : vector<16x1xf32>
    %c1_39 = arith.constant 1 : index
    %c0_40 = arith.constant 0 : index
    %91 = memref.load %arg0[%c1_39, %c0_40] : memref<2x2xf32, #tpu.memory_space<smem>>
    %92 = vector.broadcast %91 : f32 to vector<16x1xf32>
    %93 = arith.mulf %92, %90 : vector<16x1xf32>
    %94 = vector.broadcast %93 : vector<16x1xf32> to vector<16x16xf32>
    %95 = arith.mulf %94, %83 : vector<16x16xf32>
    %c1_41 = arith.constant 1 : index
    %c1_42 = arith.constant 1 : index
    %96 = memref.load %arg0[%c1_41, %c1_42] : memref<2x2xf32, #tpu.memory_space<smem>>
    %97 = vector.broadcast %96 : f32 to vector<16x16xf32>
    %98 = arith.mulf %97, %33 : vector<16x16xf32>
    %99 = arith.addf %95, %98 : vector<16x16xf32>
    %cst_43 = arith.constant dense<0.000000e+00> : vector<16x32xf32>
    %100 = tpu.matmul %99, %74, %cst_43 {dimension_numbers = #tpu.dot_dimension_numbers<[1], [0], [0], [1], [0, 0, 1, 1], [], []>} : vector<16x16xf32>, vector<16x32xf32>, vector<16x32xf32> -> vector<16x32xf32>
    %101 = arith.addf %71, %100 : vector<16x32xf32>
    %102 = vector.broadcast %4 : vector<1x32xf32> to vector<16x32xf32>
    %103 = arith.addf %101, %102 : vector<16x32xf32>
    %cst_44 = arith.constant dense<0.000000e+00> : vector<16xf32>
    %104 = vector.multi_reduction <add>, %103, %cst_44 [1] : vector<16x32xf32> to vector<16xf32>
    %105 = vector.shape_cast %104 : vector<16xf32> to vector<16x1xf32>
    %cst_45 = arith.constant 3.200000e+01 : f32
    %106 = vector.broadcast %cst_45 : f32 to vector<16x1xf32>
    %107 = arith.divf %105, %106 : vector<16x1xf32>
    %108 = vector.broadcast %107 : vector<16x1xf32> to vector<16x32xf32>
    %109 = arith.subf %103, %108 : vector<16x32xf32>
    %110 = arith.mulf %109, %109 : vector<16x32xf32>
    %cst_46 = arith.constant dense<0.000000e+00> : vector<16xf32>
    %111 = vector.multi_reduction <add>, %110, %cst_46 [1] : vector<16x32xf32> to vector<16xf32>
    %112 = vector.shape_cast %111 : vector<16xf32> to vector<16x1xf32>
    %cst_47 = arith.constant 3.200000e+01 : f32
    %113 = vector.broadcast %cst_47 : f32 to vector<16x1xf32>
    %114 = arith.divf %112, %113 : vector<16x1xf32>
    %115 = vector.broadcast %107 : vector<16x1xf32> to vector<16x32xf32>
    %116 = arith.subf %103, %115 : vector<16x32xf32>
    %cst_48 = arith.constant 9.99999974E-6 : f32
    %117 = vector.broadcast %cst_48 : f32 to vector<16x1xf32>
    %118 = arith.addf %114, %117 : vector<16x1xf32>
    %119 = math.rsqrt %118 : vector<16x1xf32>
    %120 = vector.broadcast %119 : vector<16x1xf32> to vector<16x32xf32>
    %121 = arith.mulf %116, %120 : vector<16x32xf32>
    %122 = vector.broadcast %5 : vector<1x32xf32> to vector<16x32xf32>
    %123 = arith.mulf %121, %122 : vector<16x32xf32>
    %124 = vector.broadcast %6 : vector<1x32xf32> to vector<16x32xf32>
    %125 = arith.addf %123, %124 : vector<16x32xf32>
    %cst_49 = arith.constant dense<0.000000e+00> : vector<1xf32>
    %126 = vector.multi_reduction <add>, %4, %cst_49 [1] : vector<1x32xf32> to vector<1xf32>
    %127 = vector.shape_cast %126 : vector<1xf32> to vector<1x1xf32>
    %cst_50 = arith.constant 3.200000e+01 : f32
    %128 = vector.broadcast %cst_50 : f32 to vector<1x1xf32>
    %129 = arith.divf %127, %128 : vector<1x1xf32>
    %130 = vector.broadcast %129 : vector<1x1xf32> to vector<1x32xf32>
    %131 = arith.subf %4, %130 : vector<1x32xf32>
    %132 = arith.mulf %131, %131 : vector<1x32xf32>
    %cst_51 = arith.constant dense<0.000000e+00> : vector<1xf32>
    %133 = vector.multi_reduction <add>, %132, %cst_51 [1] : vector<1x32xf32> to vector<1xf32>
    %134 = vector.shape_cast %133 : vector<1xf32> to vector<1x1xf32>
    %cst_52 = arith.constant 3.200000e+01 : f32
    %135 = vector.broadcast %cst_52 : f32 to vector<1x1xf32>
    %136 = arith.divf %134, %135 : vector<1x1xf32>
    %137 = vector.broadcast %129 : vector<1x1xf32> to vector<1x32xf32>
    %138 = arith.subf %4, %137 : vector<1x32xf32>
    %cst_53 = arith.constant 9.99999974E-6 : f32
    %139 = vector.broadcast %cst_53 : f32 to vector<1x1xf32>
    %140 = arith.addf %136, %139 : vector<1x1xf32>
    %141 = math.rsqrt %140 : vector<1x1xf32>
    %142 = vector.broadcast %141 : vector<1x1xf32> to vector<1x32xf32>
    %143 = arith.mulf %138, %142 : vector<1x32xf32>
    %144 = arith.mulf %143, %5 : vector<1x32xf32>
    %145 = arith.addf %144, %6 : vector<1x32xf32>
    %146 = vector.shape_cast %145 : vector<1x32xf32> to vector<1x32xf32>
    %147 = vector.broadcast %146 : vector<1x32xf32> to vector<16x32xf32>
    %148 = tpu.concatenate %125, %147 in 0 : vector<16x32xf32>, vector<16x32xf32> -> vector<32x32xf32>
    %149 = arith.addf %9, %148 : vector<32x32xf32>
    %cst_54 = arith.constant dense<0.000000e+00> : vector<32xf32>
    %150 = vector.multi_reduction <add>, %149, %cst_54 [1] : vector<32x32xf32> to vector<32xf32>
    %151 = vector.shape_cast %150 : vector<32xf32> to vector<32x1xf32>
    %cst_55 = arith.constant 3.200000e+01 : f32
    %152 = vector.broadcast %cst_55 : f32 to vector<32x1xf32>
    %153 = arith.divf %151, %152 : vector<32x1xf32>
    %154 = vector.broadcast %153 : vector<32x1xf32> to vector<32x32xf32>
    %155 = arith.subf %149, %154 : vector<32x32xf32>
    %156 = arith.mulf %155, %155 : vector<32x32xf32>
    %cst_56 = arith.constant dense<0.000000e+00> : vector<32xf32>
    %157 = vector.multi_reduction <add>, %156, %cst_56 [1] : vector<32x32xf32> to vector<32xf32>
    %158 = vector.shape_cast %157 : vector<32xf32> to vector<32x1xf32>
    %cst_57 = arith.constant 3.200000e+01 : f32
    %159 = vector.broadcast %cst_57 : f32 to vector<32x1xf32>
    %160 = arith.divf %158, %159 : vector<32x1xf32>
    %161 = vector.broadcast %153 : vector<32x1xf32> to vector<32x32xf32>
    %162 = arith.subf %149, %161 : vector<32x32xf32>
    %cst_58 = arith.constant 9.99999974E-6 : f32
    %163 = vector.broadcast %cst_58 : f32 to vector<32x1xf32>
    %164 = arith.addf %160, %163 : vector<32x1xf32>
    %165 = math.rsqrt %164 : vector<32x1xf32>
    %166 = vector.broadcast %165 : vector<32x1xf32> to vector<32x32xf32>
    %167 = arith.mulf %162, %166 : vector<32x32xf32>
    %168 = vector.broadcast %2 : vector<1x32xf32> to vector<32x32xf32>
    %169 = arith.mulf %167, %168 : vector<32x32xf32>
    %170 = vector.broadcast %3 : vector<1x32xf32> to vector<32x32xf32>
    %171 = arith.addf %169, %170 : vector<32x32xf32>
    %c0_59 = arith.constant 0 : index
    %c0_60 = arith.constant 0 : index
    %172 = vector.load %arg4[%c0_59, %c0_60] : memref<32x128xf32, #tpu.memory_space<vmem>>, vector<32x128xf32>
    %cst_61 = arith.constant dense<0.000000e+00> : vector<32x128xf32>
    %173 = tpu.matmul %171, %172, %cst_61 {dimension_numbers = #tpu.dot_dimension_numbers<[1], [0], [0], [1], [0, 0, 1, 1], [], []>} : vector<32x32xf32>, vector<32x128xf32>, vector<32x128xf32> -> vector<32x128xf32>
    %174 = vector.broadcast %8 : vector<1x128xf32> to vector<32x128xf32>
    %175 = arith.addf %173, %174 : vector<32x128xf32>
    %cst_62 = arith.constant 0.000000e+00 : f32
    %176 = vector.broadcast %cst_62 : f32 to vector<32x128xf32>
    %177 = arith.maximumf %175, %176 : vector<32x128xf32>
    %c0_63 = arith.constant 0 : index
    %c0_64 = arith.constant 0 : index
    %178 = vector.load %arg5[%c0_63, %c0_64] : memref<128x32xf32, #tpu.memory_space<vmem>>, vector<128x32xf32>
    %cst_65 = arith.constant dense<0.000000e+00> : vector<32x32xf32>
    %179 = tpu.matmul %177, %178, %cst_65 {dimension_numbers = #tpu.dot_dimension_numbers<[1], [0], [0], [1], [0, 0, 1, 1], [], []>} : vector<32x128xf32>, vector<128x32xf32>, vector<32x32xf32> -> vector<32x32xf32>
    %180 = vector.broadcast %7 : vector<1x32xf32> to vector<32x32xf32>
    %181 = arith.addf %179, %180 : vector<32x32xf32>
    %182 = arith.addf %149, %181 : vector<32x32xf32>
    %c0_66 = arith.constant 0 : index
    %c0_67 = arith.constant 0 : index
    %183 = vector.load %arg7[%c0_66, %c0_67] : memref<32x32xf32, #tpu.memory_space<vmem>>, vector<32x32xf32>
    tpu.vector_store %arg7[%c0_66, %c0_67], %182 {strides = array<i32>} : memref<32x32xf32, #tpu.memory_space<vmem>>, vector<32x32xf32>,
    return
  }
}

</mosaic_0001>

<bundles_post_ra>
// kernel: block_neighbour_forward.1
= control target key start
LH: loop header
LB: loop body
LE: loop exit
PB: predicated region body
PF: predicated region fallthrough
CT: control target
= control target key end

     0   :  { %12 = vsyncpa [#allocation4], 0  ;;  %s1641_s0 = inlined_call_operand.vmem [shape: f32[2,2], index: 0, kind: input, shape index: {}]   ;;  %s1642_s1 = inlined_call_operand.vmem [shape: f32[32,32], index: 1, kind: input, shape index: {}]   ;;  %s1643_s2 = inlined_call_operand.vmem [shape: f32[16,16], index: 2, kind: input, shape index: {}]   ;;  %s1644_s3 = inlined_call_operand.vmem [shape: f32[32,192], index: 3, kind: input, shape index: {}]   ;;  %s1645_s4 = inlined_call_operand.vmem [shape: f32[32,128], index: 4, kind: input, shape index: {}]   ;;  %s1646_s5 = inlined_call_operand.vmem [shape: f32[128,32], index: 5, kind: input, shape index: {}]   ;;  %s1647_s6 = inlined_call_operand.vmem [shape: f32[9,128], index: 6, kind: input, shape index: {}]   ;;  %s1648_s7 = inlined_call_operand.hbm [shape: f32[32,32], index: 7, kind: output, shape index: {}]  }
   0x1   :  { %13 = vsyncpa [#allocation3], 0  ;;  %s20_s26 = sshll.u32 %s1641_s0, 4  ;;  %s21_s26 = int_to_ptr.vmem [resolvable:$true] %s20_s26 }
   0x2   :  { %s1278_s27 = scalar_lea.vmem %s21_s26, 32  ;;  %p1283_p1 = scmp.lt.s32.totalorder %s21_s26, %s21_s26 }
   0x3   :  { %p1279_p0 = scmp.ne.s32.totalorder %s21_s26, %s1278_s27  ;;  %p1284_p2 = scmp.lt.s32.totalorder %s1278_s27, %s1278_s27 }
   0x5   :  { %p1285_p3 = por %p1284_p2, %p1283_p1 }
   0x7   :  { %p1286_p4 = pnand %p1285_p3, %p1279_p0 }
   0x9   :  { %1289 = shalt.err (!%p1286_p4)
}
   0xa   :  { %s1316_s28 = smov [#allocation2]  }
   0xb   :  { %23 = dma.vmem_to_smem %s21_s26, 32, %s1316_s28, [#allocation4]  }
   0xc   :  { %1312 = dma.done.wait [#allocation4], 32  }
   0xd   :  { %1313 = vsyncadd [#allocation4], 4294967264 }
   0xe   :  { %39 = sfence }
   0xf   :  { %v1370_v0 = vld [vmem:[%s1642_s1] sm:$0xff]  ;;  %vm53_vm0 = vcmask 261120   ;;  %v1375_v1 = vld [vmem:[%s1642_s1 + $0x8] sm:$0xff]  ;;  %v102_v15 = vld [vmem:[%s1644_s3 + $0x18] sm:$0xff]  ;;  %v1317_v21 = vmov 0.0   ;;  %s1318_s28 = smov 32  }
  0x10   :  { %v54_v2 = vsel %vm53_vm0, %v1370_v0, 0.0  ;;  %v57_v3 = vsel %vm53_vm0, %v1375_v1, 0.0  ;;  %v100_v14 = vld [vmem:[%s1644_s3 + $0x8] sm:$0xff]  ;;  %v99_v16 = vld [vmem:[%s1644_s3] sm:$0xff]  ;;  %v101_v18 = vld [vmem:[%s1644_s3 + $0x10] sm:$0xff]  ;;  %177 = vmatprep.mubr.f32.mxu0 %v1317_v21  ;;  %s1319_s29 = smov 64  }
  0x11   :  { %55 = vadd.xlane.f32.xlu0 %v54_v2  ;;  %v1151_v17 = vpack.c.bf16 %v102_v15, %v100_v14  ;;  %v104_v19 = vld [vmem:[%s1644_s3 + $0x28] sm:$0xff]  ;;  %v106_v20 = vld [vmem:[%s1644_s3 + $0x38] sm:$0xff]  ;;  %v1153_v22 = vpack.c.bf16 %v101_v18, %v99_v16  ;;  %v103_v24 = vld [vmem:[%s1644_s3 + $0x20] sm:$0xff]  ;;  %s1320_s30 = smov 96   ;;  %vm283_vm4 = vcmask 130048   ;;  %s1008_s11 = sld [smem:[#allocation2 + $0x1]] }
  0x12   :  { %v1155_v23 = vpack.c.bf16 %v106_v20, %v104_v19  ;;  %v105_v25 = vld [vmem:[%s1644_s3 + $0x30] sm:$0xff]  ;;  %v1000_v34 = vld [vmem:[%s1647_s6] ss:$0 sm:$0xff]  ;;  %v1001_v36 = vld [vmem:[%s1647_s6 + $0x1] ss:$0 sm:$0xff]  ;;  %s1461_s12 = sld [smem:[#allocation2 + $0x81]] }
  0x13   :  { %1152 = vmatprep.subr.bf16.mxu0 %v1151_v17  ;;  %v1157_v26 = vpack.c.bf16 %v105_v25, %v103_v24  ;;  %vm1160_vm1 = vmpackc.low %vm53_vm0, %vm53_vm0  ;;  %v1438_v60 = vld [vmem:[%s1643_s2] sm:$0xff]  ;;  %v1443_v61 = vld [vmem:[%s1643_s2 + $0x8] sm:$0xff]  ;;  %s310_s2 = sld [smem:[#allocation2]]  ;;  %vm669_vm5 = vcmask 253952   ;;  %s1321_s15 = smov [#allocation5]  }
  0x14   :  { %1154 = vmatpush1.bf16.msra.mxu0 %v1153_v22  ;;  %vm95_vm2 = vcmp.eq.f32.partialorder %v1438_v60, 0.0  ;;  %vm96_vm3 = vcmp.eq.f32.partialorder %v1443_v61, 0.0  ;;  %s1013_s13 = sld [smem:[#allocation2 + $0x80]]  ;;  %s988_s16 = sshll.u32 %s1321_s15, 4  ;;  %s989_s16 = int_to_ptr.vmem [resolvable:$true] %s988_s16 }
  0x15   :  { %58 = vadd.xlane.f32.xlu0 %v57_v3  ;;  %1156 = vmatprep.subr.bf16.mxu0 %v1155_v23  ;;  %v97_v2 = vsel %vm95_vm2, -1e+30, %v1317_v21  ;;  %p1295_p6 = scmp.lt.s32.totalorder %s989_s16, %s989_s16 }
  0x18   :  { %1158 = vmatpush1.bf16.msra.mxu0 %v1157_v26 }
  0x9e   :  { %v56_v4 = vpop.xlane.xlu0 %55 }
  0x9f   :  { %v61_v5 = vmul.f32 0.03125, %v56_v4 }
  0xa1   :  { %v63_v6 = vsub.f32 %v1370_v0, %v61_v5  ;;  %v98_v5 = vsel %vm96_vm3, -1e+30, %v1317_v21 }
  0xa2   :  { %v59_v7 = vpop.xlane.xlu0 %58 }
  0xa3   :  { %v62_v8 = vmul.f32 0.03125, %v59_v7  ;;  %v65_v9 = vmul.f32 %v63_v6, %v63_v6 }
  0xa5   :  { %v64_v10 = vsub.f32 %v1375_v1, %v62_v8  ;;  %v67_v11 = vsel %vm53_vm0, %v65_v9, 0.0 }
  0xa6   :  { %68 = vadd.xlane.f32.xlu1 %v67_v11 }
  0xa7   :  { %v66_v12 = vmul.f32 %v64_v10, %v64_v10 }
  0xa9   :  { %v70_v13 = vsel %vm53_vm0, %v66_v12, 0.0 }
  0xaa   :  { %71 = vadd.xlane.f32.xlu1 %v70_v13 }
 0x133   :  { %v69_v27 = vpop.xlane.xlu1 %68 }
 0x134   :  { %v73_v28 = vmul.f32 0.03125, %v69_v27 }
 0x136   :  { %v75_v29 = vadd.f32 1e-05, %v73_v28 }
 0x137   :  { %v72_v30 = vpop.xlane.xlu1 %71 }
 0x138   :  { %1244 = vrsqrt.f32 %v75_v29  ;;  %v74_v31 = vmul.f32 0.03125, %v72_v30 }
 0x13a   :  { %v76_v32 = vadd.f32 1e-05, %v74_v31 }
 0x13c   :  { %1246 = vrsqrt.f32 %v76_v32 }
 0x142   :  { %v1245_v33 = vpop.eup %1244 }
 0x143   :  { %v79_v35 = vmul.f32 %v1245_v33, %v63_v6 }
 0x145   :  { %v85_v37 = vmul.f32 %v1000_v34, %v79_v35 }
 0x146   :  { %v1247_v38 = vpop.eup %1246 }
 0x147   :  { %v91_v39 = vadd.f32 %v1001_v36, %v85_v37  ;;  %v80_v40 = vmul.f32 %v1247_v38, %v64_v10 }
 0x149   :  { %1002 = vmatmul.mubr.msk.f32.vlgmr.msra.gmra.mrb[0].mxu0 %vm53_vm0, %v91_v39  ;;  %v86_v41 = vmul.f32 %v1000_v34, %v80_v40 }
 0x14a   :  { %183 = vmatprep.mubr.f32.mxu0 %v1317_v21 }
 0x14b   :  { %v92_v42 = vadd.f32 %v1001_v36, %v86_v41 }
 0x14d   :  { %1003 = vmatmul.mubr.msk.f32.gmra.mrb[2].mxu0 %vm53_vm0, %v92_v42 }
 0x21c   :  { %v179_v43 = vpop.f32.mrb[0].mxu0 }
 0x21d   :  { %v1419_v44 = vpop.f32.mrb[1].mxu0  ;;  %1075 = vmatprep.mubr.msk.f32.mxu0 %vm53_vm0, %v179_v43 }
 0x220   :  { %v185_v45 = vpop.f32.mrb[2].mxu0 }
 0x221   :  { %v1422_v46 = vpop.f32.mrb[3].mxu0  ;;  %v1234_v47 = vpack.i.bf16 %v185_v45, %v179_v43 }
 0x222   :  { %v1239_v48 = vpack.i.bf16 %v1422_v46, %v1419_v44  ;;  %v1175_v49 = vpack.c.bf16 %v1422_v46, %v1419_v44  ;;  %v311_v46 = vstv %s310_s2 }
 0x223   :  { %1235 = vrot.lane.b32.xlu1 %v1234_v47, %s1318_s28  ;;  %1230 = vrot.lane.b32.xlu0 %v1234_v47, %s1319_s29 }
 0x224   :  { %1176 = vmatprep.subr.bf16.mxu1 %v1175_v49 }
 0x225   :  { %1178 = vmatpush3.bf16.msra.mxu1 %v1175_v49 }
 0x227   :  { %322 = vrot.lane.b32.xlu1 %v179_v43, %s1320_s30 }
 0x22b   :  { %324 = vrot.lane.b32.xlu1 %v185_v45, %s1320_s30 }
 0x295   :  { %v1236_v50 = vpop.permute.xlu1 %1235  ;;  %v1231_v51 = vpop.permute.xlu0 %1230 }
 0x296   :  { %v1238_v52 = vunpack.i.h.bf16 %v1236_v50  ;;  %v1237_v53 = vunpack.i.l.bf16 %v1236_v50  ;;  %v1233_v54 = vunpack.i.h.bf16 %v1231_v51  ;;  %v1232_v55 = vunpack.i.l.bf16 %v1231_v51 }
 0x298   :  { %v1159_v56 = vpack.c.bf16 %v1233_v54, %v1232_v55  ;;  %v1165_v57 = vpack.c.bf16 %v1238_v52, %v1237_v53 }
 0x299   :  { %v323_v58 = vpop.permute.xlu1 %322 }
 0x29a   :  { %1161 = vmatprep.subr.msk.bf16.mxu0 %vm1160_vm1, %v1159_v56 }
 0x29b   :  { %1164 = vmatpush3.bf16.xpose.msk.msra.mxu0 %vm1160_vm1, %v1159_v56 }
 0x29c   :  { %1167 = vmatprep.subr.msk.bf16.mxu0 %vm1160_vm1, %v1165_v57 }
 0x29d   :  { %v325_v59 = vpop.permute.xlu1 %324 }
 0x2a2   :  { %1076 = vmatmul.mubr.msk.f32.vlgmr.msra.gmra.mrb[4].mxu0 %vm53_vm0, %v185_v45 }
 0x2a3   :  { %1170 = vmatpush3.bf16.xpose.msk.msra.mxu0 %vm1160_vm1, %v1165_v57  ;;  %1082 = vmatprep.mubr.msk.f32.mxu0 %vm53_vm0, %v323_v58 }
 0x2aa   :  { %1083 = vmatmul.mubr.msk.f32.vlgmr.msra.gmra.mrb[6].mxu0 %vm53_vm0, %v325_v59 }
 0x375   :  { %v1077_v62 = vpop.f32.mrb[4].mxu0 }
 0x376   :  { %v270_v63 = vpop.f32.mrb[5].mxu0  ;;  %v280_v3 = vmul.f32 0.17677669, %v1077_v62 }
 0x377   :  { %v279_v4 = vmul.f32 0.17677669, %v270_v63 }
 0x378   :  { %v282_v8 = vadd.f32 %v280_v3, %v98_v5 }
 0x379   :  { %v281_v6 = vadd.f32 %v279_v4, %v97_v2 }
 0x37a   :  { %v287_v13 = vsel %vm283_vm4, %v282_v8, -inf }
 0x37b   :  { %v284_v7 = vsel %vm283_vm4, %v281_v6, -inf }
 0x37c   :  { %285 = vmax.xlane.f32.xlu0 %v284_v7  ;;  %v444_v7 = vstv %s1013_s13 }
 0x37d   :  { %v1084_v9 = vpop.f32.mrb[6].mxu0 }
 0x37e   :  { %v414_v10 = vmul.f32 0.17677669, %v1084_v9  ;;  %v404_v11 = vpop.f32.mrb[7].mxu0 }
 0x37f   :  { %v413_v12 = vmul.f32 0.17677669, %v404_v11 }
 0x380   :  { %288 = vmax.xlane.f32.xlu0 %v287_v13  ;;  %v416_v14 = vadd.f32 %v414_v10, %v98_v5 }
 0x381   :  { %v415_v15 = vadd.f32 %v413_v12, %v97_v2 }
 0x382   :  { %v420_v16 = vsel %vm283_vm4, %v416_v14, -inf }
 0x383   :  { %v417_v17 = vsel %vm283_vm4, %v415_v15, -inf }
 0x384   :  { %418 = vmax.xlane.f32.xlu1 %v417_v17  ;;  %421 = vmax.xlane.f32.xlu0 %v420_v16 }
 0x409   :  { %v286_v18 = vpop.xlane.xlu0 %285 }
 0x40a   :  { %v290_v19 = vsub.f32 %v281_v6, %v286_v18  ;;  %v450_v6 = vstv %s1461_s12 }
 0x40b   :  { %v451_v11 = vmul.f32 %v450_v6, %v1438_v60  ;;  %v452_v17 = vmul.f32 %v450_v6, %v1443_v61 }
 0x40c   :  { %v292_v20 = vmul.f32 1.442695, %v290_v19 }
 0x40d   :  { %v289_v21 = vpop.xlane.xlu0 %288 }
 0x40e   :  { %1248 = vpow2.f32 %v292_v20  ;;  %v291_v22 = vsub.f32 %v282_v8, %v289_v21 }
 0x410   :  { %v294_v23 = vmul.f32 1.442695, %v291_v22  ;;  %v625_v22 = vlaneseq }
 0x411   :  { %v419_v24 = vpop.xlane.xlu1 %418  ;;  %v422_v25 = vpop.xlane.xlu0 %421 }
 0x412   :  { %1250 = vpow2.f32 %v294_v23  ;;  %v423_v26 = vsub.f32 %v415_v15, %v419_v24  ;;  %v424_v27 = vsub.f32 %v416_v14, %v422_v25  ;;  %v626_v23 = vshrl.u32 %v625_v22, 7 }
 0x414   :  { %v425_v28 = vmul.f32 1.442695, %v423_v26  ;;  %v427_v29 = vmul.f32 1.442695, %v424_v27  ;;  %v1472_v25 = vsub.s32 0, %v626_v23 }
 0x415   :  { %v44_v26 = vld [vmem:[%s1647_s6 + $0x4] sm:$0x1] }
 0x416   :  { %1252 = vpow2.f32 %v425_v28 }
 0x417   :  { %1254 = vpow2.f32 %v427_v29 }
 0x418   :  { %v1249_v30 = vpop.eup %1248 }
 0x419   :  { %v296_v31 = vsel %vm283_vm4, %v1249_v30, 0.0 }
 0x41a   :  { %297 = vadd.xlane.f32.xlu0 %v296_v31 }
 0x41c   :  { %v1251_v32 = vpop.eup %1250 }
 0x41d   :  { %v299_v33 = vsel %vm283_vm4, %v1251_v32, 0.0 }
 0x41e   :  { %300 = vadd.xlane.f32.xlu0 %v299_v33 }
 0x420   :  { %v1253_v34 = vpop.eup %1252 }
 0x421   :  { %v429_v35 = vsel %vm283_vm4, %v1253_v34, 0.0  ;;  %v1255_v36 = vpop.eup %1254 }
 0x422   :  { %430 = vadd.xlane.f32.xlu1 %v429_v35  ;;  %v432_v37 = vsel %vm283_vm4, %v1255_v36, 0.0  ;;  %v670_v35 = vsel %vm669_vm5, %v44_v26, 0.0 }
 0x426   :  { %433 = vadd.xlane.f32.xlu1 %v432_v37 }
 0x434   :  { %1240 = vrot.lane.b32.xlu0 %v1239_v48, %s1320_s30  ;;  %v317_v48 = vstv %s1008_s11 }
 0x435   :  { %v318_v56 = vmul.f32 %v317_v48, %v1438_v60  ;;  %v319_v3 = vmul.f32 %v317_v48, %v1443_v61  ;;  %v628_v61 = vrot.slane %v44_v26, %v1472_v25 }
 0x4a7   :  { %v298_v38 = vpop.xlane.xlu0 %297 }
 0x4a8   :  { %1256 = vrcp.f32 %v298_v38 }
 0x4ab   :  { %v301_v39 = vpop.xlane.xlu0 %300 }
 0x4ac   :  { %1258 = vrcp.f32 %v301_v39 }
 0x4af   :  { %v431_v40 = vpop.xlane.xlu1 %430  ;;  %v1241_v41 = vpop.permute.xlu0 %1240 }
 0x4b0   :  { %1260 = vrcp.f32 %v431_v40  ;;  %v1243_v42 = vunpack.i.h.bf16 %v1241_v41  ;;  %v1242_v43 = vunpack.i.l.bf16 %v1241_v41 }
 0x4b2   :  { %v1257_v45 = vpop.eup %1256  ;;  %v1171_v47 = vpack.c.bf16 %v1243_v42, %v1242_v43 }
 0x4b3   :  { %v304_v49 = vmul.f32 %v1257_v45, %v298_v38  ;;  %v434_v50 = vpop.xlane.xlu1 %433 }
 0x4b4   :  { %1262 = vrcp.f32 %v434_v50  ;;  %1172 = vmatprep.subr.bf16.mxu0 %v1171_v47 }
 0x4b5   :  { %v306_v51 = vsub.f32 2.0, %v304_v49  ;;  %1174 = vmatpush3.bf16.msra.mxu0 %v1171_v47 }
 0x4b6   :  { %v1259_v44 = vpop.eup %1258 }
 0x4b7   :  { %v308_v52 = vmul.f32 %v1257_v45, %v306_v51  ;;  %v305_v53 = vmul.f32 %v1259_v44, %v301_v39 }
 0x4b9   :  { %v307_v54 = vsub.f32 2.0, %v305_v53  ;;  %v312_v55 = vmul.f32 %v311_v46, %v308_v52 }
 0x4ba   :  { %v1261_v57 = vpop.eup %1260 }
 0x4bb   :  { %v309_v58 = vmul.f32 %v1259_v44, %v307_v54  ;;  %v437_v59 = vmul.f32 %v1261_v57, %v431_v40  ;;  %v314_v62 = vmul.f32 %v1249_v30, %v312_v55 }
 0x4bd   :  { %v313_v63 = vmul.f32 %v311_v46, %v309_v58  ;;  %v439_v2 = vsub.f32 2.0, %v437_v59  ;;  %v320_v4 = vadd.f32 %v318_v56, %v314_v62  ;;  %v45_v62 = vld [vmem:[%s1647_s6 + $0x5] sm:$0x1] }
 0x4be   :  { %v1263_v5 = vpop.eup %1262 }
 0x4bf   :  { %v315_v8 = vmul.f32 %v1251_v32, %v313_v63  ;;  %v441_v9 = vmul.f32 %v1261_v57, %v439_v2  ;;  %v438_v10 = vmul.f32 %v1263_v5, %v434_v50  ;;  %1096 = vmatprep.mubr.msk.f32.mxu1 %vm283_vm4, %v320_v4  ;;  %v46_v63 = vld [vmem:[%s1647_s6 + $0x6] sm:$0x1]  ;;  %v660_v2 = vrot.slane %v45_v62, %v1472_v25 }
 0x4c1   :  { %v445_v12 = vmul.f32 %v444_v7, %v441_v9  ;;  %v440_v13 = vsub.f32 2.0, %v438_v10  ;;  %v321_v14 = vadd.f32 %v319_v3, %v315_v8 }
 0x4c3   :  { %v447_v15 = vmul.f32 %v1253_v34, %v445_v12  ;;  %v442_v16 = vmul.f32 %v1263_v5, %v440_v13  ;;  %1097 = vmatmul.mubr.msk.f32.vlgmr.msra.gmra.mrb[0].mxu1 %vm283_vm4, %v321_v14  ;;  %v666_v5 = vrot.slane %v46_v63, %v1472_v25 }
 0x4c5   :  { %v446_v18 = vmul.f32 %v444_v7, %v442_v16  ;;  %v453_v19 = vadd.f32 %v451_v11, %v447_v15 }
 0x4c7   :  { %v448_v20 = vmul.f32 %v1255_v36, %v446_v18  ;;  %1089 = vmatprep.mubr.msk.f32.mxu0 %vm283_vm4, %v453_v19 }
 0x4c9   :  { %v454_v21 = vadd.f32 %v452_v17, %v448_v20 }
 0x4cb   :  { %1090 = vmatmul.mubr.msk.f32.vlgmr.msra.gmra.mrb[8].mxu0 %vm283_vm4, %v454_v21  ;;  %v52_v21 = vld [vmem:[%s1642_s1 + $0x18] sm:$0xff] }
 0x596   :  { %v1098_v60 = vpop.f32.mrb[0].mxu1 }
 0x597   :  { %v616_v24 = vpop.f32.mrb[1].mxu1 }
 0x59e   :  { %v1091_v27 = vpop.f32.mrb[8].mxu0 }
 0x59f   :  { %v622_v28 = vadd.f32 %v1098_v60, %v1091_v27  ;;  %v535_v29 = vpop.f32.mrb[9].mxu0 }
 0x5a0   :  { %v617_v30 = vadd.f32 %v616_v24, %v535_v29 }
 0x5a1   :  { %v630_v31 = vadd.f32 %v628_v61, %v622_v28 }
 0x5a2   :  { %v629_v33 = vadd.f32 %v628_v61, %v617_v30 }
 0x5a3   :  { %v634_v32 = vsel %vm53_vm0, %v630_v31, 0.0 }
 0x5a4   :  { %635 = vadd.xlane.f32.xlu1 %v634_v32  ;;  %v631_v34 = vsel %vm53_vm0, %v629_v33, 0.0 }
 0x5a8   :  { %632 = vadd.xlane.f32.xlu1 %v631_v34 }
 0x5ac   :  { %671 = vadd.xlane.f32.xlu1 %v670_v35 }
 0x631   :  { %v636_v36 = vpop.xlane.xlu1 %635 }
 0x632   :  { %v638_v37 = vmul.f32 0.03125, %v636_v36 }
 0x634   :  { %v640_v38 = vsub.f32 %v630_v31, %v638_v37 }
 0x635   :  { %v633_v39 = vpop.xlane.xlu1 %632 }
 0x636   :  { %v637_v40 = vmul.f32 0.03125, %v633_v39  ;;  %v642_v41 = vmul.f32 %v640_v38, %v640_v38 }
 0x638   :  { %v639_v42 = vsub.f32 %v629_v33, %v637_v40  ;;  %v646_v43 = vsel %vm53_vm0, %v642_v41, 0.0 }
 0x639   :  { %647 = vadd.xlane.f32.xlu1 %v646_v43  ;;  %v672_v45 = vpop.xlane.xlu1 %671  ;;  %v761_v43 = vld [vmem:[%s1645_s4] sm:$0xff] }
 0x63a   :  { %v673_v47 = vmul.f32 0.03125, %v672_v45  ;;  %v641_v49 = vmul.f32 %v639_v42, %v639_v42  ;;  %v762_v45 = vld [vmem:[%s1645_s4 + $0x8] sm:$0xff] }
 0x63c   :  { %v674_v50 = vsub.f32 %v44_v26, %v673_v47  ;;  %v643_v51 = vsel %vm53_vm0, %v641_v49, 0.0  ;;  %v1179_v47 = vpack.c.bf16 %v762_v45, %v761_v43  ;;  %v763_v49 = vld [vmem:[%s1645_s4 + $0x10] sm:$0xff] }
 0x63d   :  { %644 = vadd.xlane.f32.xlu1 %v643_v51 }
 0x63e   :  { %v675_v44 = vmul.f32 %v674_v50, %v674_v50  ;;  %1180 = vmatprep.subr.bf16.mxu0 %v1179_v47 }
 0x63f   :  { %1182 = vmatpush3.bf16.msra.mxu0 %v1179_v47 }
 0x640   :  { %v676_v46 = vsel %vm669_vm5, %v675_v44, 0.0  ;;  %v870_v44 = vld [vmem:[%s1646_s5] sm:$0xff] }
 0x641   :  { %677 = vadd.xlane.f32.xlu1 %v676_v46  ;;  %v871_v46 = vld [vmem:[%s1646_s5 + $0x8] sm:$0xff] }
 0x6c6   :  { %v648_v48 = vpop.xlane.xlu1 %647 }
 0x6c7   :  { %v650_v52 = vmul.f32 0.03125, %v648_v48  ;;  %v872_v48 = vld [vmem:[%s1646_s5 + $0x10] sm:$0xff] }
 0x6c9   :  { %v652_v53 = vadd.f32 1e-05, %v650_v52  ;;  %v1187_v52 = vpack.c.bf16 %v871_v46, %v870_v44 }
 0x6ca   :  { %v645_v54 = vpop.xlane.xlu1 %644 }
 0x6cb   :  { %1264 = vrsqrt.f32 %v652_v53  ;;  %v649_v55 = vmul.f32 0.03125, %v645_v54  ;;  %v873_v53 = vld [vmem:[%s1646_s5 + $0x18] sm:$0xff]  ;;  %1188 = vmatprep.subr.bf16.mxu1 %v1187_v52 }
 0x6cc   :  { %v1191_v54 = vpack.c.bf16 %v873_v53, %v872_v48  ;;  %1190 = vmatpush3.bf16.msra.mxu1 %v1187_v52 }
 0x6cd   :  { %v651_v56 = vadd.f32 1e-05, %v649_v55  ;;  %v874_v55 = vld [vmem:[%s1646_s5 + $0x20] sm:$0xff] }
 0x6ce   :  { %v678_v57 = vpop.xlane.xlu1 %677  ;;  %1192 = vmatprep.subr.bf16.mxu1 %v1191_v54 }
 0x6cf   :  { %1266 = vrsqrt.f32 %v651_v56  ;;  %v679_v58 = vmul.f32 0.03125, %v678_v57  ;;  %v875_v56 = vld [vmem:[%s1646_s5 + $0x28] sm:$0xff] }
 0x6d0   :  { %v1195_v57 = vpack.c.bf16 %v875_v56, %v874_v55  ;;  %1194 = vmatpush3.bf16.msra.mxu1 %v1191_v54  ;;  %v1026_v56 = vld [vmem:[%s1647_s6 + $0x7] ss:$0 sm:$0xff] }
 0x6d1   :  { %v680_v59 = vadd.f32 1e-05, %v679_v58  ;;  %v876_v58 = vld [vmem:[%s1646_s5 + $0x30] sm:$0xff] }
 0x6d2   :  { %1196 = vmatprep.subr.bf16.mxu1 %v1195_v57 }
 0x6d3   :  { %1268 = vrsqrt.f32 %v680_v59  ;;  %v877_v59 = vld [vmem:[%s1646_s5 + $0x38] sm:$0xff] }
 0x6d4   :  { %1198 = vmatpush3.bf16.msra.mxu1 %v1195_v57 }
 0x6d5   :  { %v1265_v3 = vpop.eup %1264 }
 0x6d6   :  { %v656_v4 = vmul.f32 %v1265_v3, %v640_v38 }
 0x6d8   :  { %v662_v6 = vmul.f32 %v660_v2, %v656_v4  ;;  %v880_v4 = vld [vmem:[%s1646_s5 + $0x50] sm:$0xff] }
 0x6d9   :  { %v1267_v7 = vpop.eup %1266 }
 0x6da   :  { %v668_v8 = vadd.f32 %v666_v5, %v662_v6  ;;  %v655_v9 = vmul.f32 %v1267_v7, %v639_v42  ;;  %v882_v7 = vld [vmem:[%s1646_s5 + $0x60] sm:$0xff] }
 0x6dc   :  { %v1493_v10 = vadd.f32 %v668_v8, %v1375_v1  ;;  %v661_v11 = vmul.f32 %v660_v2, %v655_v9  ;;  %v51_v1 = vld [vmem:[%s1642_s1 + $0x10] sm:$0xff]  ;;  %v879_v2 = vld [vmem:[%s1646_s5 + $0x48] sm:$0xff] }
 0x6dd   :  { %v1269_v12 = vpop.eup %1268  ;;  %v883_v8 = vld [vmem:[%s1646_s5 + $0x68] sm:$0xff] }
 0x6de   :  { %v682_v13 = vmul.f32 %v1269_v12, %v674_v50  ;;  %v696_v14 = vsel %vm53_vm0, %v1493_v10, 0.0  ;;  %v667_v15 = vadd.f32 %v666_v5, %v661_v11  ;;  %v764_v50 = vld [vmem:[%s1645_s4 + $0x18] sm:$0xff]  ;;  %v1211_v9 = vpack.c.bf16 %v883_v8, %v882_v7 }
 0x6df   :  { %697 = vadd.xlane.f32.xlu1 %v696_v14  ;;  %v1183_v51 = vpack.c.bf16 %v764_v50, %v763_v49  ;;  %v881_v5 = vld [vmem:[%s1646_s5 + $0x58] sm:$0xff] }
 0x6e0   :  { %v1498_v16 = vadd.f32 %v667_v15, %v1370_v0  ;;  %v683_v17 = vmul.f32 %v682_v13, %v45_v62  ;;  %v1199_v62 = vpack.c.bf16 %v877_v59, %v876_v58  ;;  %v1207_v6 = vpack.c.bf16 %v881_v5, %v880_v4 }
 0x6e1   :  { %1184 = vmatprep.subr.bf16.mxu0 %v1183_v51 }
 0x6e2   :  { %v693_v18 = vsel %vm53_vm0, %v1498_v16, 0.0  ;;  %v684_v19 = vadd.f32 %v683_v17, %v46_v63  ;;  %1186 = vmatpush3.bf16.msra.mxu0 %v1183_v51  ;;  %v878_v63 = vld [vmem:[%s1646_s5 + $0x40] sm:$0xff]  ;;  %1200 = vmatprep.subr.bf16.mxu1 %v1199_v62 }
 0x6e3   :  { %694 = vadd.xlane.f32.xlu0 %v693_v18  ;;  %v1203_v3 = vpack.c.bf16 %v879_v2, %v878_v63  ;;  %1202 = vmatpush3.bf16.msra.mxu1 %v1199_v62 }
 0x6e4   :  { %v688_v20 = vrot.slane %v684_v19, %v1472_v25 }
 0x6e5   :  { %1204 = vmatprep.subr.bf16.mxu1 %v1203_v3 }
 0x6e6   :  { %v1509_v22 = vadd.f32 %v688_v20, %v51_v1  ;;  %v1513_v23 = vadd.f32 %v688_v20, %v52_v21 }
 0x6e7   :  { %1206 = vmatpush3.bf16.msra.mxu1 %v1203_v3 }
 0x6e8   :  { %v699_v0 = vsel %vm53_vm0, %v1509_v22, 0.0  ;;  %v702_v60 = vsel %vm53_vm0, %v1513_v23, 0.0  ;;  %1208 = vmatprep.subr.bf16.mxu1 %v1207_v6 }
 0x6e9   :  { %700 = vadd.xlane.f32.xlu1 %v699_v0 }
 0x6eb   :  { %1210 = vmatpush3.bf16.msra.mxu1 %v1207_v6 }
 0x6ec   :  { %1212 = vmatprep.subr.bf16.mxu1 %v1211_v9 }
 0x6ed   :  { %703 = vadd.xlane.f32.xlu1 %v702_v60 }
 0x6ef   :  { %1214 = vmatpush3.bf16.msra.mxu1 %v1211_v9 }
 0x76c   :  { %v698_v24 = vpop.xlane.xlu1 %697 }
 0x76d   :  { %v706_v26 = vmul.f32 0.03125, %v698_v24 }
 0x76f   :  { %v1518_v25 = vsub.f32 %v1493_v10, %v706_v26  ;;  %v1019_v26 = vld [vmem:[%s1647_s6 + $0x2] ss:$0 sm:$0xff] }
 0x770   :  { %v695_v61 = vpop.xlane.xlu0 %694 }
 0x771   :  { %v705_v27 = vmul.f32 0.03125, %v695_v61  ;;  %v714_v28 = vmul.f32 %v1518_v25, %v1518_v25 }
 0x773   :  { %v1523_v29 = vsub.f32 %v1498_v16, %v705_v27  ;;  %v720_v30 = vsel %vm53_vm0, %v714_v28, 0.0 }
 0x774   :  { %721 = vadd.xlane.f32.xlu1 %v720_v30  ;;  %v1020_v30 = vld [vmem:[%s1647_s6 + $0x3] ss:$0 sm:$0xff] }
 0x775   :  { %v713_v31 = vmul.f32 %v1523_v29, %v1523_v29 }
 0x776   :  { %v701_v32 = vpop.xlane.xlu1 %700 }
 0x777   :  { %v707_v33 = vmul.f32 0.03125, %v701_v32  ;;  %v717_v34 = vsel %vm53_vm0, %v713_v31, 0.0 }
 0x778   :  { %718 = vadd.xlane.f32.xlu1 %v717_v34 }
 0x779   :  { %v1530_v35 = vsub.f32 %v1509_v22, %v707_v33 }
 0x77a   :  { %v704_v36 = vpop.xlane.xlu1 %703 }
 0x77b   :  { %v708_v37 = vmul.f32 0.03125, %v704_v36  ;;  %v715_v38 = vmul.f32 %v1530_v35, %v1530_v35 }
 0x77d   :  { %v1535_v39 = vsub.f32 %v1513_v23, %v708_v37  ;;  %v723_v40 = vsel %vm53_vm0, %v715_v38, 0.0 }
 0x77e   :  { %724 = vadd.xlane.f32.xlu1 %v723_v40 }
 0x77f   :  { %v716_v41 = vmul.f32 %v1535_v39, %v1535_v39 }
 0x781   :  { %v726_v42 = vsel %vm53_vm0, %v716_v41, 0.0 }
 0x782   :  { %727 = vadd.xlane.f32.xlu1 %v726_v42  ;;  %v884_v42 = vld [vmem:[%s1646_s5 + $0x70] sm:$0xff] }
 0x801   :  { %v722_v11 = vpop.xlane.xlu1 %721 }
 0x802   :  { %v730_v12 = vmul.f32 0.03125, %v722_v11 }
 0x804   :  { %v734_v13 = vadd.f32 1e-05, %v730_v12 }
 0x805   :  { %v719_v14 = vpop.xlane.xlu1 %718 }
 0x806   :  { %1270 = vrsqrt.f32 %v734_v13  ;;  %v729_v15 = vmul.f32 0.03125, %v719_v14 }
 0x808   :  { %v733_v17 = vadd.f32 1e-05, %v729_v15 }
 0x80a   :  { %1272 = vrsqrt.f32 %v733_v17 }
 0x80b   :  { %v725_v18 = vpop.xlane.xlu1 %724 }
 0x80c   :  { %v731_v19 = vmul.f32 0.03125, %v725_v18 }
 0x80e   :  { %v735_v1 = vadd.f32 1e-05, %v731_v19 }
 0x80f   :  { %v728_v20 = vpop.xlane.xlu1 %727 }
 0x810   :  { %v1271_v21 = vpop.eup %1270  ;;  %1274 = vrsqrt.f32 %v735_v1  ;;  %v732_v0 = vmul.f32 0.03125, %v728_v20 }
 0x811   :  { %v742_v60 = vmul.f32 %v1271_v21, %v1518_v25 }
 0x812   :  { %v736_v24 = vadd.f32 1e-05, %v732_v0 }
 0x813   :  { %v750_v28 = vmul.f32 %v1019_v26, %v742_v60 }
 0x814   :  { %v1273_v61 = vpop.eup %1272  ;;  %1276 = vrsqrt.f32 %v736_v24 }
 0x815   :  { %v741_v27 = vmul.f32 %v1273_v61, %v1523_v29  ;;  %v758_v34 = vadd.f32 %v1020_v30, %v750_v28 }
 0x817   :  { %v749_v31 = vmul.f32 %v1019_v26, %v741_v27 }
 0x819   :  { %v757_v32 = vadd.f32 %v1020_v30, %v749_v31 }
 0x81a   :  { %v1275_v33 = vpop.eup %1274 }
 0x81b   :  { %1107 = vmatprep.mubr.msk.f32.mxu0 %vm53_vm0, %v757_v32  ;;  %v743_v25 = vmul.f32 %v1275_v33, %v1530_v35  ;;  %v885_v35 = vld [vmem:[%s1646_s5 + $0x78] sm:$0xff] }
 0x81c   :  { %1108 = vmatmul.mubr.msk.f32.vlgmr.msra.gmra.mrb[10].mxu0 %vm53_vm0, %v758_v34  ;;  %v1215_v43 = vpack.c.bf16 %v885_v35, %v884_v42 }
 0x81d   :  { %v751_v36 = vmul.f32 %v1019_v26, %v743_v25 }
 0x81e   :  { %v1277_v37 = vpop.eup %1276  ;;  %1216 = vmatprep.subr.bf16.mxu1 %v1215_v43 }
 0x81f   :  { %v759_v38 = vadd.f32 %v1020_v30, %v751_v36  ;;  %v744_v29 = vmul.f32 %v1277_v37, %v1535_v39  ;;  %1218 = vmatpush3.bf16.msra.mxu1 %v1215_v43  ;;  %v1021_v39 = vld [vmem:[%s1647_s6 + $0x8] ss:$0 sm:$0xff]  ;;  %s1290_s6 = scalar_lea.vmem %s989_s16, 512 }
 0x820   :  { %p1291_p5 = scmp.ne.s32.totalorder %s989_s16, %s1290_s6  ;;  %p1296_p7 = scmp.lt.s32.totalorder %s1290_s6, %s1290_s6 }
 0x821   :  { %1110 = vmatprep.mubr.msk.f32.mxu0 %vm53_vm0, %v759_v38  ;;  %v752_v40 = vmul.f32 %v1019_v26, %v744_v29 }
 0x822   :  { %p1297_p8 = por %p1296_p7, %p1295_p6 }
 0x823   :  { %v760_v41 = vadd.f32 %v1020_v30, %v752_v40 }
 0x824   :  { %p1298_p9 = pnand %p1297_p8, %p1291_p5 }
 0x825   :  { %1111 = vmatmul.mubr.msk.f32.gmra.mrb[12].mxu0 %vm53_vm0, %v760_v41 }
 0x8ef   :  { %v1109_v45 = vpop.f32.mrb[10].mxu0 }
 0x8f0   :  { %v853_v47 = vadd.f32 %v1109_v45, %v1021_v39  ;;  %v847_v49 = vpop.f32.mrb[11].mxu0 }
 0x8f1   :  { %v848_v50 = vadd.f32 %v1021_v39, %v847_v49 }
 0x8f2   :  { %v867_v44 = vmax.f32 %v853_v47, 0.0 }
 0x8f3   :  { %v866_v51 = vmax.f32 %v848_v50, 0.0 }
 0x8f5   :  { %1145 = vmatprep.mubr.f32.mxu1 %v866_v51 }
 0x8f6   :  { %1146 = vmatmul.mubr.f32.vlgmr.msra.gmra.mrb[2].mxu1 %v867_v44 }
 0x8f8   :  { %v1112_v46 = vpop.f32.mrb[12].mxu0 }
 0x8f9   :  { %v863_v48 = vadd.f32 %v1112_v46, %v1021_v39  ;;  %v857_v52 = vpop.f32.mrb[13].mxu0 }
 0x8fa   :  { %v858_v53 = vadd.f32 %v1021_v39, %v857_v52 }
 0x8fb   :  { %v869_v55 = vmax.f32 %v863_v48, 0.0 }
 0x8fc   :  { %v868_v54 = vmax.f32 %v858_v53, 0.0 }
 0x8fe   :  { %1148 = vmatprep.mubr.f32.mxu1 %v868_v54 }
 0x8ff   :  { %1149 = vmatmul.mubr.f32.gmra.mrb[4].mxu1 %v869_v55 }
 0x9c9   :  { %v1147_v57 = vpop.f32.mrb[2].mxu1 }
 0x9ca   :  { %v962_v58 = vadd.f32 %v1147_v57, %v1026_v56  ;;  %v956_v59 = vpop.f32.mrb[3].mxu1 }
 0x9cb   :  { %v957_v62 = vadd.f32 %v1026_v56, %v956_v59 }
 0x9cc   :  { %v976_v63 = vadd.f32 %v962_v58, %v1493_v10 }
 0x9cd   :  { %v975_v2 = vadd.f32 %v957_v62, %v1498_v16 }
 0x9ce   :  { %980 = vst.msk [vmem:[#allocation5 + $0x8] sm:$0xff] %vm53_vm0, %v976_v63 }
 0x9cf   :  { %979 = vst.msk [vmem:[#allocation5] sm:$0xff] %vm53_vm0, %v975_v2 }
 0x9d2   :  { %v1150_v3 = vpop.f32.mrb[4].mxu1 }
 0x9d3   :  { %v972_v4 = vadd.f32 %v1150_v3, %v1026_v56  ;;  %v966_v5 = vpop.f32.mrb[5].mxu1 }
 0x9d4   :  { %v967_v6 = vadd.f32 %v1026_v56, %v966_v5 }
 0x9d5   :  { %v978_v7 = vadd.f32 %v972_v4, %v1513_v23 }
 0x9d6   :  { %v977_v8 = vadd.f32 %v967_v6, %v1509_v22 }
 0x9d7   :  { %982 = vst.msk [vmem:[#allocation5 + $0x18] sm:$0xff] %vm53_vm0, %v978_v7 }
 0x9d8   :  { %981 = vst.msk [vmem:[#allocation5 + $0x10] sm:$0xff] %vm53_vm0, %v977_v8 }
 0x9d9   :  { %1301 = shalt.err (!%p1298_p9)
}
 0x9da   :  { %s1302_s19 = scalar_lea.hbm %s1648_s7, 512 }
 0x9db   :  { %p1303_p10 = scmp.ne.s32.totalorder %s1648_s7, %s1302_s19  ;;  %p1306_p11 = scmp.lt.u32.totalorder %s1302_s19, %s1648_s7 }
 0x9dd   :  { %p1308_p12 = pnand %p1306_p11, %p1303_p10 }
 0x9df   :  { %1311 = shalt.err (!%p1308_p12)
}
 0x9e0   :  { %s1322_s1 = smov 128   ;;  %s1323_s24 = smov 8  }
 0x9e1   :  { %994 = dma.vmem_to_hbm [thread:$0]  %s989_s16, 512, %s1648_s7, [#allocation3], %s1322_s1, %s1322_s1, %s1323_s24  }
 0x9e2   :  { %1314 = dma.done.wait [#allocation3], 512  }
 0x9e3   :  { %1315 = vsyncadd [#allocation3], 4294966784 }
 0x9e4   :  { %998 = vsyncpa [#allocation3], 1 }
 0x9e5   :  { %999 = vsyncpa [#allocation4], 1 }

</bundles_post_ra>
